<compile_context>
chip_gen: v7x
topology: tpu7x:2x2x1
jax: 0.10.0
libtpu: 0.0.40
codegen_flags: <defaults>
</compile_context>

<pallas_src>
import functools

import jax
import jax.numpy as jnp
from jax.experimental import pallas as pl
from jax.experimental.pallas import tpu as pltpu

K1 = 784          # input features (28*28)
H1 = 256
H2 = 128
N_CLASSES = 10
N_PAD = 128       # final layer padded to one lane-dense vreg width


def _round_up(x, m):
    return (x + m - 1) // m * m


def mlp_kernel(x_ref, w1_ref, b1_ref, w2_ref, b2_ref, w3_ref, b3_ref,
               mask_ref, o_ref):
    # x_ref: (TB, 784) f32 (cast to bf16 here -> no wrapper pad/cast pass).
    # Weights are (in, out) bf16; biases (1, out) f32; mask (1, 128) f32.
    x = x_ref[...].astype(jnp.bfloat16)

    # ---- dense1 + ReLU (f32 accumulation on the MXU) -----------------------
    h1 = jnp.dot(x, w1_ref[...], preferred_element_type=jnp.float32)
    h1 = jnp.maximum(h1 + b1_ref[...], 0.0)

    # ---- dense2 + ReLU -----------------------------------------------------
    h2 = jnp.dot(h1.astype(jnp.bfloat16), w2_ref[...],
                 preferred_element_type=jnp.float32)
    h2 = jnp.maximum(h2 + b2_ref[...], 0.0)

    # ---- dense3 + ReLU (output padded to 128 lanes) ------------------------
    h3 = jnp.dot(h2.astype(jnp.bfloat16), w3_ref[...],
                 preferred_element_type=jnp.float32)
    h3 = jnp.maximum(h3 + b3_ref[...], 0.0)

    # Additive mask: 0 for the 10 real classes, -1e30 for the 118 pad lanes.
    # Applied AFTER the ReLU so exp(pad - m) == 0 in the softmax reductions.
    h3 = h3 + mask_ref[...]

    # ---- log_softmax over the real classes ---------------------------------
    m = jnp.max(h3, axis=-1, keepdims=True)
    shifted = h3 - m
    lse = jnp.log(jnp.sum(jnp.exp(shifted), axis=-1, keepdims=True))
    o_ref[...] = (shifted - lse).astype(o_ref.dtype)


@functools.partial(jax.jit, static_argnames=("block_b",))
def mlp_forward(x_nchw, params, *, block_b=1024):
    """x_nchw: (B, 1, 28, 28) float32. Returns (B, 10) log-probabilities."""
    w1, b1, w2, b2, w3, b3 = params
    B = x_nchw.shape[0]
    x = x_nchw.reshape(B, K1).astype(jnp.float32)          # (B, 784), no copy pass

    # Balanced batch tiling:
    #  * >= 2 grid steps for large B (v7x: shard batch across both TCs),
    #  * tile size balanced across blocks (padding waste < 8 rows per block),
    #  * last (partial) tile handled by Pallas edge-block masking.
    min_blocks = 2 if B >= 512 else 1
    n_blocks = max(min_blocks, pl.cdiv(B, block_b))
    TB = _round_up(pl.cdiv(B, n_blocks), 8)
    grid = (pl.cdiv(B, TB),)

    # PyTorch (out, in) -> (in, out); pad layer-3 N to 128 lanes with zeros.
    w1t = jnp.asarray(w1.T, jnp.bfloat16)                   # (784, 256)
    w2t = jnp.asarray(w2.T, jnp.bfloat16)                   # (256, 128)
    w3t = jnp.zeros((H2, N_PAD), jnp.bfloat16).at[:, :N_CLASSES].set(
        w3.T.astype(jnp.bfloat16))
    b1r = b1.reshape(1, H1).astype(jnp.float32)
    b2r = b2.reshape(1, H2).astype(jnp.float32)
    b3r = jnp.zeros((1, N_PAD), jnp.float32).at[:, :N_CLASSES].set(
        b3.astype(jnp.float32))
    mask = jnp.where(jnp.arange(N_PAD) < N_CLASSES, 0.0, -1e30)
    mask = mask.astype(jnp.float32).reshape(1, N_PAD)

    # Weights/biases/mask are resident in VMEM across all grid steps.
    resident = lambda shape: pl.BlockSpec(shape, lambda i: (0, 0))

    # VMEM budget from actual needs, capped below v7x's 64 MiB/TC.
    k1_lanes = _round_up(K1, 128)
    weight_bytes = (K1 * H1 + H1 * H2 + H2 * N_PAD) * 2 \
        + (H1 + H2 + 2 * N_PAD) * 4
    x_tile_bytes = 2 * TB * k1_lanes * 4                    # double-buffered f32 x
    out_tile_bytes = 2 * TB * N_PAD * 4                     # double-buffered f32 out
    act_bytes = TB * (H1 + H2 + 2 * N_PAD) * 4              # h1/h2/h3 + softmax temps
    vmem_limit = min(
        2 * (weight_bytes + x_tile_bytes + out_tile_bytes + act_bytes) + (8 << 20),
        48 << 20)

    out_pad = pl.pallas_call(
        mlp_kernel,
        out_shape=jax.ShapeDtypeStruct((B, N_PAD), jnp.float32),
        grid=grid,
        in_specs=[
            pl.BlockSpec((TB, K1), lambda i: (i, 0)),        # x: batch-tiled
            resident(w1t.shape), resident(b1r.shape),
            resident(w2t.shape), resident(b2r.shape),
            resident(w3t.shape), resident(b3r.shape),
            resident(mask.shape),
        ],
        out_specs=pl.BlockSpec((TB, N_PAD), lambda i: (i, 0)),  # lane-dense store
        compiler_params=pltpu.CompilerParams(
            dimension_semantics=("parallel",),
            vmem_limit_bytes=vmem_limit,
        ),
    )(x, w1t, b1r, w2t, b2r, w3t, b3r, mask)

    return out_pad[:, :N_CLASSES]


def init_params(key):
    """Deterministic params with the shapes nn.Linear would create."""
    def linear_init(key, out_f, in_f):
        kw, kb = jax.random.split(key)
        bound = 1.0 / jnp.sqrt(in_f)
        w = jax.random.uniform(kw, (out_f, in_f), jnp.float32, -bound, bound)
        b = jax.random.uniform(kb, (out_f,), jnp.float32, -bound, bound)
        return w, b

    k1, k2, k3 = jax.random.split(key, 3)
    w1, b1 = linear_init(k1, 256, K1)
    w2, b2 = linear_init(k2, 128, 256)
    w3, b3 = linear_init(k3, 10, 128)
    return (w1, b1, w2, b2, w3, b3)


def reference_forward(x_nchw, params):
    """Pure-JAX f32 reference matching the PyTorch forward exactly."""
    w1, b1, w2, b2, w3, b3 = params
    x = x_nchw.reshape(x_nchw.shape[0], -1)
    x = jax.nn.relu(x @ w1.T + b1)
    x = jax.nn.relu(x @ w2.T + b2)
    x = jax.nn.relu(x @ w3.T + b3)
    return jax.nn.log_softmax(x, axis=1)


if __name__ == "__main__":
    key = jax.random.PRNGKey(0)
    kx, kp = jax.random.split(key)

    B = 8
    x = jax.random.normal(kx, (B, 1, 28, 28), jnp.float32)   # MNIST-shaped input
    params = init_params(kp)

    out = mlp_forward(x, params)
    out = jax.block_until_ready(out)

    ref = reference_forward(x, params)
    assert out.shape == (B, N_CLASSES)
    assert bool(jnp.all(jnp.isfinite(out)))
    # bf16 matmul inputs (with f32 accumulation) vs full-f32 reference.
    max_err = float(jnp.max(jnp.abs(out - ref)))
    assert max_err < 7.5e-2, f"mismatch vs reference (max abs err {max_err})"

    print("KERNEL_OK")
</pallas_src>

<mosaic_0001>
module attributes {stable_mosaic.version = 11 : i64} {
  func.func @mlp_kernel(%arg0: i32, %arg1: memref<8x784xf32, #tpu.memory_space<vmem>>, %arg2: memref<784x256xbf16, #tpu.memory_space<vmem>>, %arg3: memref<1x256xf32, #tpu.memory_space<vmem>>, %arg4: memref<256x128xbf16, #tpu.memory_space<vmem>>, %arg5: memref<1x128xf32, #tpu.memory_space<vmem>>, %arg6: memref<128x128xbf16, #tpu.memory_space<vmem>>, %arg7: memref<1x128xf32, #tpu.memory_space<vmem>>, %arg8: memref<1x128xf32, #tpu.memory_space<vmem>>, %arg9: memref<8x128xf32, #tpu.memory_space<vmem>>) attributes {dimension_semantics = [#tpu.dimension_semantics<parallel>], iteration_bounds = array<i64: 1>, scalar_prefetch = 0 : i64, scratch_operands = 0 : i64, tpu.core_type = #tpu.core_type<tc>, window_params = [{transform_indices = @transform_0, window_bounds = array<i64: 8, 784>}, {pipeline_mode = #tpu.pipeline_mode<synchronous>, transform_indices = @transform_1, window_bounds = array<i64: 784, 256>}, {pipeline_mode = #tpu.pipeline_mode<synchronous>, transform_indices = @transform_2, window_bounds = array<i64: 1, 256>}, {pipeline_mode = #tpu.pipeline_mode<synchronous>, transform_indices = @transform_3, window_bounds = array<i64: 256, 128>}, {pipeline_mode = #tpu.pipeline_mode<synchronous>, transform_indices = @transform_4, window_bounds = array<i64: 1, 128>}, {pipeline_mode = #tpu.pipeline_mode<synchronous>, transform_indices = @transform_5, window_bounds = array<i64: 128, 128>}, {pipeline_mode = #tpu.pipeline_mode<synchronous>, transform_indices = @transform_6, window_bounds = array<i64: 1, 128>}, {pipeline_mode = #tpu.pipeline_mode<synchronous>, transform_indices = @transform_7, window_bounds = array<i64: 1, 128>}, {transform_indices = @transform_8, window_bounds = array<i64: 8, 128>}]} {
    %c0 = arith.constant 0 : index
    %c0_0 = arith.constant 0 : index
    %0 = vector.load %arg1[%c0, %c0_0] : memref<8x784xf32, #tpu.memory_space<vmem>>, vector<8x784xf32>
    %1 = arith.truncf %0 : vector<8x784xf32> to vector<8x784xbf16>
    %c0_1 = arith.constant 0 : index
    %c0_2 = arith.constant 0 : index
    %2 = vector.load %arg2[%c0_1, %c0_2] : memref<784x256xbf16, #tpu.memory_space<vmem>>, vector<784x256xbf16>
    %cst = arith.constant dense<0.000000e+00> : vector<8x256xf32>
    %3 = tpu.matmul %1, %2, %cst {dimension_numbers = #tpu.dot_dimension_numbers<[1], [0], [0], [1], [0, 0, 1, 1], [], []>} : vector<8x784xbf16>, vector<784x256xbf16>, vector<8x256xf32> -> vector<8x256xf32>
    %c0_3 = arith.constant 0 : index
    %c0_4 = arith.constant 0 : index
    %4 = vector.load %arg3[%c0_3, %c0_4] : memref<1x256xf32, #tpu.memory_space<vmem>>, vector<1x256xf32>
    %5 = vector.broadcast %4 : vector<1x256xf32> to vector<8x256xf32>
    %6 = arith.addf %3, %5 : vector<8x256xf32>
    %cst_5 = arith.constant 0.000000e+00 : f32
    %7 = vector.broadcast %cst_5 : f32 to vector<8x256xf32>
    %8 = arith.maximumf %6, %7 : vector<8x256xf32>
    %9 = arith.truncf %8 : vector<8x256xf32> to vector<8x256xbf16>
    %c0_6 = arith.constant 0 : index
    %c0_7 = arith.constant 0 : index
    %10 = vector.load %arg4[%c0_6, %c0_7] : memref<256x128xbf16, #tpu.memory_space<vmem>>, vector<256x128xbf16>
    %cst_8 = arith.constant dense<0.000000e+00> : vector<8x128xf32>
    %11 = tpu.matmul %9, %10, %cst_8 {dimension_numbers = #tpu.dot_dimension_numbers<[1], [0], [0], [1], [0, 0, 1, 1], [], []>} : vector<8x256xbf16>, vector<256x128xbf16>, vector<8x128xf32> -> vector<8x128xf32>
    %c0_9 = arith.constant 0 : index
    %c0_10 = arith.constant 0 : index
    %12 = vector.load %arg5[%c0_9, %c0_10] : memref<1x128xf32, #tpu.memory_space<vmem>>, vector<1x128xf32>
    %13 = vector.broadcast %12 : vector<1x128xf32> to vector<8x128xf32>
    %14 = arith.addf %11, %13 : vector<8x128xf32>
    %cst_11 = arith.constant 0.000000e+00 : f32
    %15 = vector.broadcast %cst_11 : f32 to vector<8x128xf32>
    %16 = arith.maximumf %14, %15 : vector<8x128xf32>
    %17 = arith.truncf %16 : vector<8x128xf32> to vector<8x128xbf16>
    %c0_12 = arith.constant 0 : index
    %c0_13 = arith.constant 0 : index
    %18 = vector.load %arg6[%c0_12, %c0_13] : memref<128x128xbf16, #tpu.memory_space<vmem>>, vector<128x128xbf16>
    %cst_14 = arith.constant dense<0.000000e+00> : vector<8x128xf32>
    %19 = tpu.matmul %17, %18, %cst_14 {dimension_numbers = #tpu.dot_dimension_numbers<[1], [0], [0], [1], [0, 0, 1, 1], [], []>} : vector<8x128xbf16>, vector<128x128xbf16>, vector<8x128xf32> -> vector<8x128xf32>
    %c0_15 = arith.constant 0 : index
    %c0_16 = arith.constant 0 : index
    %20 = vector.load %arg7[%c0_15, %c0_16] : memref<1x128xf32, #tpu.memory_space<vmem>>, vector<1x128xf32>
    %21 = vector.broadcast %20 : vector<1x128xf32> to vector<8x128xf32>
    %22 = arith.addf %19, %21 : vector<8x128xf32>
    %cst_17 = arith.constant 0.000000e+00 : f32
    %23 = vector.broadcast %cst_17 : f32 to vector<8x128xf32>
    %24 = arith.maximumf %22, %23 : vector<8x128xf32>
    %c0_18 = arith.constant 0 : index
    %c0_19 = arith.constant 0 : index
    %25 = vector.load %arg8[%c0_18, %c0_19] : memref<1x128xf32, #tpu.memory_space<vmem>>, vector<1x128xf32>
    %26 = vector.broadcast %25 : vector<1x128xf32> to vector<8x128xf32>
    %27 = arith.addf %24, %26 : vector<8x128xf32>
    %cst_20 = arith.constant dense<0xFF800000> : vector<8xf32>
    %28 = vector.multi_reduction <maximumf>, %27, %cst_20 [1] : vector<8x128xf32> to vector<8xf32>
    %29 = vector.shape_cast %28 : vector<8xf32> to vector<8x1xf32>
    %30 = vector.broadcast %29 : vector<8x1xf32> to vector<8x128xf32>
    %31 = arith.subf %27, %30 : vector<8x128xf32>
    %32 = math.exp %31 : vector<8x128xf32>
    %cst_21 = arith.constant dense<0.000000e+00> : vector<8xf32>
    %33 = vector.multi_reduction <add>, %32, %cst_21 [1] : vector<8x128xf32> to vector<8xf32>
    %34 = vector.shape_cast %33 : vector<8xf32> to vector<8x1xf32>
    %35 = math.log %34 : vector<8x1xf32>
    %36 = vector.broadcast %35 : vector<8x1xf32> to vector<8x128xf32>
    %37 = arith.subf %31, %36 : vector<8x128xf32>
    %c0_22 = arith.constant 0 : index
    %c0_23 = arith.constant 0 : index
    %38 = vector.load %arg9[%c0_22, %c0_23] : memref<8x128xf32, #tpu.memory_space<vmem>>, vector<8x128xf32>
    tpu.vector_store %arg9[%c0_22, %c0_23], %37 {strides = array<i32>} : memref<8x128xf32, #tpu.memory_space<vmem>>, vector<8x128xf32>,
    return
  }
  func.func @transform_0(%arg0: i32) -> (i32, i32) {
    %c0_i32 = arith.constant 0 : i32
    %c0_i32_0 = arith.constant 0 : i32
    return %arg0, %c0_i32 : i32, i32
  }
  func.func @transform_1(%arg0: i32) -> (i32, i32) {
    %c0_i32 = arith.constant 0 : i32
    %c0_i32_0 = arith.constant 0 : i32
    %c0_i32_1 = arith.constant 0 : i32
    return %c0_i32, %c0_i32_0 : i32, i32
  }
  func.func @transform_2(%arg0: i32) -> (i32, i32) {
    %c0_i32 = arith.constant 0 : i32
    %c0_i32_0 = arith.constant 0 : i32
    %c0_i32_1 = arith.constant 0 : i32
    return %c0_i32, %c0_i32_0 : i32, i32
  }
  func.func @transform_3(%arg0: i32) -> (i32, i32) {
    %c0_i32 = arith.constant 0 : i32
    %c0_i32_0 = arith.constant 0 : i32
    %c0_i32_1 = arith.constant 0 : i32
    return %c0_i32, %c0_i32_0 : i32, i32
  }
  func.func @transform_4(%arg0: i32) -> (i32, i32) {
    %c0_i32 = arith.constant 0 : i32
    %c0_i32_0 = arith.constant 0 : i32
    %c0_i32_1 = arith.constant 0 : i32
    return %c0_i32, %c0_i32_0 : i32, i32
  }
  func.func @transform_5(%arg0: i32) -> (i32, i32) {
    %c0_i32 = arith.constant 0 : i32
    %c0_i32_0 = arith.constant 0 : i32
    %c0_i32_1 = arith.constant 0 : i32
    return %c0_i32, %c0_i32_0 : i32, i32
  }
  func.func @transform_6(%arg0: i32) -> (i32, i32) {
    %c0_i32 = arith.constant 0 : i32
    %c0_i32_0 = arith.constant 0 : i32
    %c0_i32_1 = arith.constant 0 : i32
    return %c0_i32, %c0_i32_0 : i32, i32
  }
  func.func @transform_7(%arg0: i32) -> (i32, i32) {
    %c0_i32 = arith.constant 0 : i32
    %c0_i32_0 = arith.constant 0 : i32
    %c0_i32_1 = arith.constant 0 : i32
    return %c0_i32, %c0_i32_0 : i32, i32
  }
  func.func @transform_8(%arg0: i32) -> (i32, i32) {
    %c0_i32 = arith.constant 0 : i32
    %c0_i32_0 = arith.constant 0 : i32
    return %arg0, %c0_i32 : i32, i32
  }
}

</mosaic_0001>

<bundles_post_ra>
// kernel: mlp_forward.1
= control target key start
LH: loop header
LB: loop body
LE: loop exit
PB: predicated region body
PF: predicated region fallthrough
CT: control target
= control target key end

     0   :  { %s1991_s0 = inlined_call_operand.vmem [shape: f32[8,784], index: 0, kind: input, shape index: {}]   ;;  %s1992_s1 = inlined_call_operand.vmem [shape: bf16[784,256], index: 1, kind: input, shape index: {}]   ;;  %s1993_s2 = inlined_call_operand.vmem [shape: f32[1,256], index: 2, kind: input, shape index: {}]   ;;  %s1994_s3 = inlined_call_operand.vmem [shape: bf16[256,128], index: 3, kind: input, shape index: {}]   ;;  %s1995_s4 = inlined_call_operand.vmem [shape: f32[1,128], index: 4, kind: input, shape index: {}]   ;;  %s1996_s5 = inlined_call_operand.vmem [shape: bf16[128,128], index: 5, kind: input, shape index: {}]   ;;  %s1997_s6 = inlined_call_operand.vmem [shape: f32[1,128], index: 6, kind: input, shape index: {}]   ;;  %s1998_s7 = inlined_call_operand.vmem [shape: f32[1,128], index: 7, kind: input, shape index: {}]   ;;  %s1999_s8 = inlined_call_operand.hbm [shape: f32[8,128], index: 8, kind: output, shape index: {}]  }
   0x1   :  { %v1332_v0 = vld [vmem:[%s1992_s1 + $0x104] ss:$8 sps:$4 sm:$0xff]   ;;  %v1334_v1 = vld [vmem:[%s1992_s1 + $0x100] ss:$8 sps:$4 sm:$0xff]   ;;  %v1335_v2 = vld [vmem:[%s1992_s1 + $0x114] ss:$8 sps:$4 sm:$0xff]  }
   0x2   :  { %690 = vmatprep.subr.bf16.mxu0 %v1332_v0  ;;  %v1337_v3 = vld [vmem:[%s1992_s1 + $0x110] ss:$8 sps:$4 sm:$0xff]   ;;  %v1338_v4 = vld [vmem:[%s1992_s1 + $0x124] ss:$8 sps:$4 sm:$0xff]   ;;  %v1340_v5 = vld [vmem:[%s1992_s1 + $0x120] ss:$8 sps:$4 sm:$0xff]  }
   0x3   :  { %691 = vmatpush1.bf16.msra.mxu0 %v1334_v1  ;;  %v1341_v6 = vld [vmem:[%s1992_s1 + $0x134] ss:$8 sps:$4 sm:$0xff]   ;;  %v1343_v7 = vld [vmem:[%s1992_s1 + $0x130] ss:$8 sps:$4 sm:$0xff]   ;;  %v1344_v8 = vld [vmem:[%s1992_s1 + $0x144] ss:$8 sps:$4 sm:$0xff]  }
   0x4   :  { %692 = vmatprep.subr.bf16.mxu0 %v1335_v2  ;;  %v1346_v9 = vld [vmem:[%s1992_s1 + $0x140] ss:$8 sps:$4 sm:$0xff]   ;;  %v1347_v10 = vld [vmem:[%s1992_s1 + $0x154] ss:$8 sps:$4 sm:$0xff]   ;;  %v1349_v11 = vld [vmem:[%s1992_s1 + $0x150] ss:$8 sps:$4 sm:$0xff]  }
   0x5   :  { %v1350_v12 = vld [vmem:[%s1992_s1 + $0x164] ss:$8 sps:$4 sm:$0xff]   ;;  %v34_v13 = vld [vmem:[%s1991_s0 + $0x18] sm:$0xff]  ;;  %v1352_v15 = vld [vmem:[%s1992_s1 + $0x160] ss:$8 sps:$4 sm:$0xff]  }
   0x6   :  { %v41_v14 = vpack.c.bf16 %v34_v13, %v34_v13  ;;  %v1353_v16 = vld [vmem:[%s1992_s1 + $0x174] ss:$8 sps:$4 sm:$0xff]   ;;  %v1386_v17 = vld [vmem:[%s1992_s1 + $0x4] ss:$8 sps:$4 sm:$0xff]   ;;  %v1355_v18 = vld [vmem:[%s1992_s1 + $0x170] ss:$8 sps:$4 sm:$0xff]  }
   0x7   :  { %693 = vmatpush1.bf16.msra.mxu0 %v1337_v3  ;;  %v1356_v19 = vld [vmem:[%s1992_s1 + $0x184] ss:$8 sps:$4 sm:$0xff]   ;;  %649 = vmatprep.subr.bf16.mxu1 %v1386_v17  ;;  %v1391_v20 = vld [vmem:[%s1992_s1] ss:$8 sps:$4 sm:$0xff]   ;;  %v1392_v21 = vld [vmem:[%s1992_s1 + $0x14] ss:$8 sps:$4 sm:$0xff]  }
   0x8   :  { %694 = vmatprep.subr.bf16.mxu0 %v1338_v4  ;;  %722 = vmatprep.mubr.bf16.mxu0 %v41_v14  ;;  %v1397_v22 = vld [vmem:[%s1992_s1 + $0x10] ss:$8 sps:$4 sm:$0xff]   ;;  %v1398_v23 = vld [vmem:[%s1992_s1 + $0x24] ss:$8 sps:$4 sm:$0xff]   ;;  %v1358_v24 = vld [vmem:[%s1992_s1 + $0x180] ss:$8 sps:$4 sm:$0xff]  }
   0x9   :  { %650 = vmatpush1.bf16.msra.mxu1 %v1391_v20  ;;  %v1359_v25 = vld [vmem:[%s1992_s1 + $0x194] ss:$8 sps:$4 sm:$0xff]   ;;  %v1403_v26 = vld [vmem:[%s1992_s1 + $0x20] ss:$8 sps:$4 sm:$0xff]   ;;  %v1361_v28 = vld [vmem:[%s1992_s1 + $0x190] ss:$8 sps:$4 sm:$0xff]  }
   0xa   :  { %651 = vmatprep.subr.bf16.mxu1 %v1392_v21  ;;  %v1404_v27 = vld [vmem:[%s1992_s1 + $0x34] ss:$8 sps:$4 sm:$0xff]   ;;  %v1362_v29 = vld [vmem:[%s1992_s1 + $0x1a4] ss:$8 sps:$4 sm:$0xff]   ;;  %v1409_v30 = vld [vmem:[%s1992_s1 + $0x30] ss:$8 sps:$4 sm:$0xff]  }
   0xb   :  { %695 = vmatpush1.bf16.msra.mxu0 %v1340_v5  ;;  %v1410_v31 = vld [vmem:[%s1992_s1 + $0x44] ss:$8 sps:$4 sm:$0xff]   ;;  %v1364_v32 = vld [vmem:[%s1992_s1 + $0x1a0] ss:$8 sps:$4 sm:$0xff]   ;;  %v1365_v33 = vld [vmem:[%s1992_s1 + $0x1b4] ss:$8 sps:$4 sm:$0xff]  }
   0xc   :  { %696 = vmatprep.subr.bf16.mxu0 %v1341_v6  ;;  %v1415_v34 = vld [vmem:[%s1992_s1 + $0x40] ss:$8 sps:$4 sm:$0xff]   ;;  %v1416_v35 = vld [vmem:[%s1992_s1 + $0x54] ss:$8 sps:$4 sm:$0xff]   ;;  %v1367_v36 = vld [vmem:[%s1992_s1 + $0x1b0] ss:$8 sps:$4 sm:$0xff]  }
   0xd   :  { %652 = vmatpush1.bf16.msra.mxu1 %v1397_v22  ;;  %v1368_v37 = vld [vmem:[%s1992_s1 + $0x1c4] ss:$8 sps:$4 sm:$0xff]   ;;  %v1421_v38 = vld [vmem:[%s1992_s1 + $0x50] ss:$8 sps:$4 sm:$0xff]   ;;  %v1370_v40 = vld [vmem:[%s1992_s1 + $0x1c0] ss:$8 sps:$4 sm:$0xff]  }
   0xe   :  { %653 = vmatprep.subr.bf16.mxu1 %v1398_v23  ;;  %v1422_v39 = vld [vmem:[%s1992_s1 + $0x64] ss:$8 sps:$4 sm:$0xff]   ;;  %v1371_v41 = vld [vmem:[%s1992_s1 + $0x1d4] ss:$8 sps:$4 sm:$0xff]   ;;  %v1427_v42 = vld [vmem:[%s1992_s1 + $0x60] ss:$8 sps:$4 sm:$0xff]  }
   0xf   :  { %697 = vmatpush1.bf16.msra.mxu0 %v1343_v7  ;;  %v1428_v43 = vld [vmem:[%s1992_s1 + $0x74] ss:$8 sps:$4 sm:$0xff]   ;;  %v1373_v44 = vld [vmem:[%s1992_s1 + $0x1d0] ss:$8 sps:$4 sm:$0xff]   ;;  %v1374_v45 = vld [vmem:[%s1992_s1 + $0x1e4] ss:$8 sps:$4 sm:$0xff]  }
  0x10   :  { %698 = vmatprep.subr.bf16.mxu0 %v1344_v8  ;;  %v1433_v46 = vld [vmem:[%s1992_s1 + $0x70] ss:$8 sps:$4 sm:$0xff]   ;;  %v1434_v47 = vld [vmem:[%s1992_s1 + $0x84] ss:$8 sps:$4 sm:$0xff]   ;;  %v1376_v48 = vld [vmem:[%s1992_s1 + $0x1e0] ss:$8 sps:$4 sm:$0xff]  }
  0x11   :  { %654 = vmatpush1.bf16.msra.mxu1 %v1403_v26  ;;  %v1377_v49 = vld [vmem:[%s1992_s1 + $0x1f4] ss:$8 sps:$4 sm:$0xff]   ;;  %v1439_v50 = vld [vmem:[%s1992_s1 + $0x80] ss:$8 sps:$4 sm:$0xff]   ;;  %v1379_v51 = vld [vmem:[%s1992_s1 + $0x1f0] ss:$8 sps:$4 sm:$0xff]  }
  0x12   :  { %655 = vmatprep.subr.bf16.mxu1 %v1404_v27  ;;  %v1440_v52 = vld [vmem:[%s1992_s1 + $0x94] ss:$8 sps:$4 sm:$0xff]   ;;  %v1382_v54 = vld [vmem:[%s1992_s1 + $0x204] ss:$8 sps:$4 sm:$0xff]   ;;  %v1445_v55 = vld [vmem:[%s1992_s1 + $0x90] ss:$8 sps:$4 sm:$0xff]  }
  0x13   :  { %699 = vmatpush1.bf16.msra.mxu0 %v1346_v9  ;;  %v33_v53 = vld [vmem:[%s1991_s0 + $0x10] sm:$0xff]  ;;  %v1446_v56 = vld [vmem:[%s1992_s1 + $0xa4] ss:$8 sps:$4 sm:$0xff]   ;;  %v1380_v59 = vld [vmem:[%s1992_s1 + $0x200] ss:$8 sps:$4 sm:$0xff]  }
  0x14   :  { %700 = vmatprep.subr.bf16.mxu0 %v1347_v10  ;;  %v40_v57 = vpack.c.bf16 %v33_v53, %v33_v53  ;;  %v36_v58 = vld [vmem:[%s1991_s0 + $0x28] sm:$0xff]  ;;  %v1385_v61 = vld [vmem:[%s1992_s1 + $0x214] ss:$8 sps:$4 sm:$0xff]   ;;  %v1383_v1 = vld [vmem:[%s1992_s1 + $0x210] ss:$8 sps:$4 sm:$0xff]  }
  0x15   :  { %656 = vmatpush1.bf16.msra.mxu1 %v1409_v30  ;;  %v43_v60 = vpack.c.bf16 %v36_v58, %v36_v58  ;;  %v1451_v62 = vld [vmem:[%s1992_s1 + $0xa0] ss:$8 sps:$4 sm:$0xff]   ;;  %v1452_v63 = vld [vmem:[%s1992_s1 + $0xb4] ss:$8 sps:$4 sm:$0xff]   ;;  %v1390_v3 = vld [vmem:[%s1992_s1 + $0x224] ss:$8 sps:$4 sm:$0xff]  }
  0x16   :  { %657 = vmatprep.subr.bf16.mxu1 %v1410_v31  ;;  %v32_v0 = vld [vmem:[%s1991_s0 + $0x8] sm:$0xff]  ;;  %v1457_v4 = vld [vmem:[%s1992_s1 + $0xb0] ss:$8 sps:$4 sm:$0xff]   ;;  %v1396_v7 = vld [vmem:[%s1992_s1 + $0x234] ss:$8 sps:$4 sm:$0xff]  }
  0x17   :  { %701 = vmatpush1.bf16.msra.mxu0 %v1349_v11  ;;  %v39_v2 = vpack.c.bf16 %v32_v0, %v32_v0  ;;  %v1458_v5 = vld [vmem:[%s1992_s1 + $0xc4] ss:$8 sps:$4 sm:$0xff]   ;;  %v1388_v6 = vld [vmem:[%s1992_s1 + $0x220] ss:$8 sps:$4 sm:$0xff]   ;;  %v1464_v9 = vld [vmem:[%s1992_s1 + $0xd4] ss:$8 sps:$4 sm:$0xff]  }
  0x18   :  { %702 = vmatprep.subr.bf16.mxu0 %v1350_v12  ;;  %v1463_v8 = vld [vmem:[%s1992_s1 + $0xc0] ss:$8 sps:$4 sm:$0xff]   ;;  %v1394_v10 = vld [vmem:[%s1992_s1 + $0x230] ss:$8 sps:$4 sm:$0xff]   ;;  %v1402_v11 = vld [vmem:[%s1992_s1 + $0x244] ss:$8 sps:$4 sm:$0xff]  }
  0x19   :  { %658 = vmatpush1.bf16.msra.mxu1 %v1415_v34  ;;  %681 = vmatprep.mubr.bf16.mxu1 %v39_v2  ;;  %v1400_v12 = vld [vmem:[%s1992_s1 + $0x240] ss:$8 sps:$4 sm:$0xff]   ;;  %v1469_v13 = vld [vmem:[%s1992_s1 + $0xd0] ss:$8 sps:$4 sm:$0xff]   ;;  %v1470_v14 = vld [vmem:[%s1992_s1 + $0xe4] ss:$8 sps:$4 sm:$0xff]  }
  0x1a   :  { %659 = vmatprep.subr.bf16.mxu1 %v1416_v35  ;;  %v1476_v17 = vld [vmem:[%s1992_s1 + $0xf4] ss:$8 sps:$4 sm:$0xff]   ;;  %v1478_v20 = vld [vmem:[%s1992_s1 + $0xf0] ss:$8 sps:$4 sm:$0xff]   ;;  %v31_v21 = vld [vmem:[%s1991_s0] sm:$0xff] }
  0x1b   :  { %703 = vmatpush1.bf16.msra.mxu0 %v1352_v15  ;;  %v1408_v15 = vld [vmem:[%s1992_s1 + $0x254] ss:$8 sps:$4 sm:$0xff]   ;;  %v1479_v22 = vld [vmem:[%s1994_s3 + $0x40] sm:$0xff]  }
  0x1c   :  { %704 = vmatprep.subr.bf16.mxu0 %v1353_v16  ;;  %v1475_v16 = vld [vmem:[%s1992_s1 + $0xe0] ss:$8 sps:$4 sm:$0xff]  }
  0x1d   :  { %660 = vmatpush1.bf16.msra.mxu1 %v1421_v38  ;;  %v1412_v23 = vld [vmem:[%s1992_s1 + $0x260] ss:$8 sps:$4 sm:$0xff]  }
  0x1e   :  { %661 = vmatprep.subr.bf16.mxu1 %v1422_v39 }
  0x1f   :  { %705 = vmatpush1.bf16.msra.mxu0 %v1355_v18  ;;  %v1406_v18 = vld [vmem:[%s1992_s1 + $0x250] ss:$8 sps:$4 sm:$0xff]  }
  0x20   :  { %706 = vmatprep.subr.bf16.mxu0 %v1356_v19  ;;  %v1414_v19 = vld [vmem:[%s1992_s1 + $0x264] ss:$8 sps:$4 sm:$0xff]  }
  0x21   :  { %662 = vmatpush1.bf16.msra.mxu1 %v1427_v42 }
  0x22   :  { %663 = vmatprep.subr.bf16.mxu1 %v1428_v43 }
  0x23   :  { %707 = vmatpush1.bf16.msra.mxu0 %v1358_v24 }
  0x24   :  { %708 = vmatprep.subr.bf16.mxu0 %v1359_v25 }
  0x25   :  { %664 = vmatpush1.bf16.msra.mxu1 %v1433_v46 }
  0x26   :  { %665 = vmatprep.subr.bf16.mxu1 %v1434_v47 }
  0x27   :  { %709 = vmatpush1.bf16.msra.mxu0 %v1361_v28 }
  0x28   :  { %710 = vmatprep.subr.bf16.mxu0 %v1362_v29 }
  0x29   :  { %666 = vmatpush1.bf16.msra.mxu1 %v1439_v50 }
  0x2a   :  { %667 = vmatprep.subr.bf16.mxu1 %v1440_v52 }
  0x2b   :  { %711 = vmatpush1.bf16.msra.mxu0 %v1364_v32 }
  0x2c   :  { %712 = vmatprep.subr.bf16.mxu0 %v1365_v33 }
  0x2d   :  { %668 = vmatpush1.bf16.msra.mxu1 %v1445_v55 }
  0x2e   :  { %669 = vmatprep.subr.bf16.mxu1 %v1446_v56 }
  0x2f   :  { %713 = vmatpush1.bf16.msra.mxu0 %v1367_v36 }
  0x30   :  { %714 = vmatprep.subr.bf16.mxu0 %v1368_v37 }
  0x31   :  { %670 = vmatpush1.bf16.msra.mxu1 %v1451_v62 }
  0x32   :  { %671 = vmatprep.subr.bf16.mxu1 %v1452_v63 }
  0x33   :  { %715 = vmatpush1.bf16.msra.mxu0 %v1370_v40 }
  0x34   :  { %716 = vmatprep.subr.bf16.mxu0 %v1371_v41 }
  0x35   :  { %672 = vmatpush1.bf16.msra.mxu1 %v1457_v4 }
  0x36   :  { %673 = vmatprep.subr.bf16.mxu1 %v1458_v5 }
  0x37   :  { %717 = vmatpush1.bf16.msra.mxu0 %v1373_v44 }
  0x38   :  { %718 = vmatprep.subr.bf16.mxu0 %v1374_v45 }
  0x39   :  { %674 = vmatpush1.bf16.msra.mxu1 %v1463_v8 }
  0x3a   :  { %675 = vmatprep.subr.bf16.mxu1 %v1464_v9 }
  0x3b   :  { %719 = vmatpush1.bf16.msra.mxu0 %v1376_v48 }
  0x3c   :  { %720 = vmatprep.subr.bf16.mxu0 %v1377_v49 }
  0x3d   :  { %676 = vmatpush1.bf16.msra.mxu1 %v1469_v13 }
  0x3e   :  { %677 = vmatprep.subr.bf16.mxu1 %v1470_v14 }
  0x3f   :  { %721 = vmatpush1.bf16.msra.mxu0 %v1379_v51 }
  0x40   :  { %731 = vmatprep.subr.bf16.mxu0 %v1382_v54 }
  0x41   :  { %678 = vmatpush1.bf16.msra.mxu1 %v1475_v16 }
  0x42   :  { %723 = vmatmul.mubr.bf16.vlgmr.msra.gmra.mrb[0].mxu0 %v40_v57  ;;  %679 = vmatprep.subr.bf16.mxu1 %v1476_v17 }
  0x43   :  { %732 = vmatpush1.bf16.msra.mxu0 %v1380_v59  ;;  %763 = vmatprep.mubr.bf16.mxu0 %v43_v60 }
  0x44   :  { %733 = vmatprep.subr.bf16.mxu0 %v1385_v61 }
  0x47   :  { %734 = vmatpush1.bf16.msra.mxu0 %v1383_v1 }
  0x48   :  { %735 = vmatprep.subr.bf16.mxu0 %v1390_v3 }
  0x4b   :  { %736 = vmatpush1.bf16.msra.mxu0 %v1388_v6 }
  0x4c   :  { %737 = vmatprep.subr.bf16.mxu0 %v1396_v7 }
  0x4f   :  { %738 = vmatpush1.bf16.msra.mxu0 %v1394_v10 }
  0x50   :  { %739 = vmatprep.subr.bf16.mxu0 %v1402_v11 }
  0x53   :  { %740 = vmatpush1.bf16.msra.mxu0 %v1400_v12 }
  0x54   :  { %741 = vmatprep.subr.bf16.mxu0 %v1408_v15 }
  0x57   :  { %742 = vmatpush1.bf16.msra.mxu0 %v1406_v18 }
  0x58   :  { %13 = vsyncpa [#allocation3], 0  ;;  %743 = vmatprep.subr.bf16.mxu0 %v1414_v19  ;;  %v1420_v24 = vld [vmem:[%s1992_s1 + $0x274] ss:$8 sps:$4 sm:$0xff]   ;;  %v38_v25 = vpack.c.bf16 %v31_v21, %v31_v21  ;;  %680 = vmatpush1.bf16.msra.mxu1 %v1478_v20  ;;  %v1480_v26 = vld [vmem:[%s1994_s3] sm:$0xff]   ;;  %v1531_v56 = vmov 0   ;;  %v145_v6 = vlaneseq }
  0x59   :  { %1265 = vmatprep.subr.bf16.mxu1 %v1479_v22  ;;  %v1481_v27 = vld [vmem:[%s1994_s3 + $0x48] sm:$0xff]   ;;  %v1418_v28 = vld [vmem:[%s1992_s1 + $0x270] ss:$8 sps:$4 sm:$0xff]   ;;  %v1432_v33 = vld [vmem:[%s1992_s1 + $0x294] ss:$8 sps:$4 sm:$0xff]   ;;  %vm645_vm0 = vcmask 130048  }
  0x5a   :  { %v1426_v29 = vld [vmem:[%s1992_s1 + $0x284] ss:$8 sps:$4 sm:$0xff]   ;;  %v1483_v31 = vld [vmem:[%s1994_s3 + $0x50] sm:$0xff]   ;;  %v1424_v32 = vld [vmem:[%s1992_s1 + $0x280] ss:$8 sps:$4 sm:$0xff]   ;;  %v1532_v1 = vmov 0.0  }
  0x5b   :  { %744 = vmatpush1.bf16.msra.mxu0 %v1412_v23  ;;  %682 = vmatmul.mubr.bf16.vlgmr.msra.gmra.mrb[0].mxu1 %v38_v25  ;;  %v1482_v30 = vld [vmem:[%s1994_s3 + $0x8] sm:$0xff]   ;;  %v1484_v34 = vld [vmem:[%s1994_s3 + $0x10] sm:$0xff]   ;;  %v1485_v35 = vld [vmem:[%s1994_s3 + $0x58] sm:$0xff]   ;;  %v146_v7 = vshrl.u32 %v145_v6, 7  ;;  %vm1533_vm1 = vmmov 0  }
  0x5c   :  { %745 = vmatprep.subr.bf16.mxu0 %v1420_v24  ;;  %1266 = vmatpush3.bf16.msra.mxu1 %v1480_v26  ;;  %v1430_v36 = vld [vmem:[%s1992_s1 + $0x290] ss:$8 sps:$4 sm:$0xff]   ;;  %v1438_v37 = vld [vmem:[%s1992_s1 + $0x2a4] ss:$8 sps:$4 sm:$0xff]   ;;  %v1436_v40 = vld [vmem:[%s1992_s1 + $0x2a0] ss:$8 sps:$4 sm:$0xff]  }
  0x5d   :  { %1267 = vmatprep.subr.bf16.mxu1 %v1481_v27  ;;  %v1486_v38 = vld [vmem:[%s1994_s3 + $0x18] sm:$0xff]   ;;  %v1487_v39 = vld [vmem:[%s1994_s3 + $0x60] sm:$0xff]   ;;  %v37_v57 = vld [vmem:[%s1991_s0 + $0x30] sm:$0xff]  ;;  %v147_v8 = vsub.s32 0, %v146_v7  ;;  %v151_v10 = vsub.s32 1, %v146_v7 }
  0x5e   :  { %v1444_v41 = vld [vmem:[%s1992_s1 + $0x2b4] ss:$8 sps:$4 sm:$0xff]   ;;  %v1488_v42 = vld [vmem:[%s1994_s3 + $0x20] sm:$0xff]   ;;  %v1442_v43 = vld [vmem:[%s1992_s1 + $0x2b0] ss:$8 sps:$4 sm:$0xff]   ;;  %v44_v58 = vpack.c.bf16 %v37_v57, %v37_v57 }
  0x5f   :  { %746 = vmatpush1.bf16.msra.mxu0 %v1418_v28  ;;  %v1450_v44 = vld [vmem:[%s1992_s1 + $0x2c4] ss:$8 sps:$4 sm:$0xff]   ;;  %v1448_v45 = vld [vmem:[%s1992_s1 + $0x2c0] ss:$8 sps:$4 sm:$0xff]   ;;  %v1456_v46 = vld [vmem:[%s1992_s1 + $0x2d4] ss:$8 sps:$4 sm:$0xff]  }
  0x60   :  { %747 = vmatprep.subr.bf16.mxu0 %v1426_v29  ;;  %1268 = vmatpush3.bf16.msra.mxu1 %v1482_v30  ;;  %v1454_v47 = vld [vmem:[%s1992_s1 + $0x2d0] ss:$8 sps:$4 sm:$0xff]   ;;  %v1462_v48 = vld [vmem:[%s1992_s1 + $0x2e4] ss:$8 sps:$4 sm:$0xff]   ;;  %v1460_v49 = vld [vmem:[%s1992_s1 + $0x2e0] ss:$8 sps:$4 sm:$0xff]  }
  0x61   :  { %1269 = vmatprep.subr.bf16.mxu1 %v1483_v31  ;;  %v1468_v50 = vld [vmem:[%s1992_s1 + $0x2f4] ss:$8 sps:$4 sm:$0xff]   ;;  %v1466_v51 = vld [vmem:[%s1992_s1 + $0x2f0] ss:$8 sps:$4 sm:$0xff]   ;;  %v35_v52 = vld [vmem:[%s1991_s0 + $0x20] sm:$0xff] }
  0x62   :  { %v1474_v53 = vld [vmem:[%s1992_s1 + $0x304] ss:$8 sps:$4 sm:$0xff]   ;;  %v42_v54 = vpack.c.bf16 %v35_v52, %v35_v52  ;;  %v1472_v55 = vld [vmem:[%s1992_s1 + $0x300] ss:$8 sps:$4 sm:$0xff]   ;;  %v1491_v61 = vld [vmem:[%s1994_s3 + $0x70] sm:$0xff]  }
  0x63   :  { %748 = vmatpush1.bf16.msra.mxu0 %v1424_v32  ;;  %v1489_v59 = vld [vmem:[%s1994_s3 + $0x68] sm:$0xff]   ;;  %v1492_v62 = vld [vmem:[%s1994_s3 + $0x30] sm:$0xff]   ;;  %v1493_v63 = vld [vmem:[%s1994_s3 + $0x78] sm:$0xff]  }
  0x64   :  { %749 = vmatprep.subr.bf16.mxu0 %v1432_v33  ;;  %1270 = vmatpush3.bf16.msra.mxu1 %v1484_v34  ;;  %v1490_v60 = vld [vmem:[%s1994_s3 + $0x28] sm:$0xff]   ;;  %v1494_v0 = vld [vmem:[%s1994_s3 + $0x38] sm:$0xff]   ;;  %v143_v9 = vld [vmem:[%s1993_s2] sm:$0x3] }
  0x65   :  { %1271 = vmatprep.subr.bf16.mxu1 %v1485_v35  ;;  %v148_v11 = vrot.slane %v143_v9, %v147_v8  ;;  %v152_v12 = vrot.slane %v143_v9, %v151_v10  ;;  %v1495_v24 = vld [vmem:[%s1996_s5] sm:$0xff]   ;;  %v1496_v26 = vld [vmem:[%s1996_s5 + $0x8] sm:$0xff]   ;;  %v1497_v27 = vld [vmem:[%s1996_s5 + $0x10] sm:$0xff]  }
  0x66   :  { %v1498_v28 = vld [vmem:[%s1996_s5 + $0x18] sm:$0xff]   ;;  %v1499_v29 = vld [vmem:[%s1996_s5 + $0x20] sm:$0xff]   ;;  %v1500_v30 = vld [vmem:[%s1996_s5 + $0x28] sm:$0xff]  }
  0x67   :  { %750 = vmatpush1.bf16.msra.mxu0 %v1430_v36  ;;  %v1501_v31 = vld [vmem:[%s1996_s5 + $0x30] sm:$0xff]   ;;  %v1502_v32 = vld [vmem:[%s1996_s5 + $0x38] sm:$0xff]   ;;  %v1238_v34 = vld [vmem:[%s1995_s4] ss:$0 sm:$0xff]  ;;  %s1534_s4 = smov [#allocation2]  }
  0x68   :  { %751 = vmatprep.subr.bf16.mxu0 %v1438_v37  ;;  %1272 = vmatpush3.bf16.msra.mxu1 %v1486_v38 }
  0x69   :  { %1273 = vmatprep.subr.bf16.mxu1 %v1487_v39 }
  0x6b   :  { %752 = vmatpush1.bf16.msra.mxu0 %v1436_v40 }
  0x6c   :  { %753 = vmatprep.subr.bf16.mxu0 %v1444_v41  ;;  %1274 = vmatpush3.bf16.msra.mxu1 %v1488_v42  ;;  %v1255_v42 = vld [vmem:[%s1997_s6] ss:$0 sm:$0xff]  ;;  %s1131_s6 = sshll.u32 %s1534_s4, 4  ;;  %s1132_s6 = int_to_ptr.vmem [resolvable:$true] %s1131_s6 }
  0x6d   :  { %1275 = vmatprep.subr.bf16.mxu1 %v1489_v59  ;;  %p1512_p1 = scmp.lt.s32.totalorder %s1132_s6, %s1132_s6 }
  0x6f   :  { %754 = vmatpush1.bf16.msra.mxu0 %v1442_v43 }
  0x70   :  { %755 = vmatprep.subr.bf16.mxu0 %v1450_v44  ;;  %1276 = vmatpush3.bf16.msra.mxu1 %v1490_v60 }
  0x71   :  { %1277 = vmatprep.subr.bf16.mxu1 %v1491_v61 }
  0x73   :  { %756 = vmatpush1.bf16.msra.mxu0 %v1448_v45 }
  0x74   :  { %757 = vmatprep.subr.bf16.mxu0 %v1456_v46  ;;  %1278 = vmatpush3.bf16.msra.mxu1 %v1492_v62 }
  0x75   :  { %1279 = vmatprep.subr.bf16.mxu1 %v1493_v63 }
  0x77   :  { %758 = vmatpush1.bf16.msra.mxu0 %v1454_v47  ;;  %v1264_v47 = vld [vmem:[%s1998_s7] ss:$0 sm:$0xff]  ;;  %s1507_s7 = scalar_lea.vmem %s1132_s6, 128 }
  0x78   :  { %759 = vmatprep.subr.bf16.mxu0 %v1462_v48  ;;  %1280 = vmatpush3.bf16.msra.mxu1 %v1494_v0  ;;  %p1508_p0 = scmp.ne.s32.totalorder %s1132_s6, %s1507_s7  ;;  %p1513_p2 = scmp.lt.s32.totalorder %s1507_s7, %s1507_s7 }
  0x79   :  { %1296 = vmatprep.subr.bf16.mxu1 %v1532_v1 }
  0x7a   :  { %p1514_p3 = por %p1513_p2, %p1512_p1 }
  0x7b   :  { %760 = vmatpush1.bf16.msra.mxu0 %v1460_v49 }
  0x7c   :  { %761 = vmatprep.subr.bf16.mxu0 %v1468_v50  ;;  %p1515_p4 = pnand %p1514_p3, %p1508_p0 }
  0x7f   :  { %762 = vmatpush1.bf16.msra.mxu0 %v1466_v51 }
  0x80   :  { %772 = vmatprep.subr.bf16.mxu0 %v1474_v53 }
  0x82   :  { %764 = vmatmul.mubr.bf16.vlgmr.msra.gmra.mrb[0].mxu0 %v42_v54 }
  0x83   :  { %773 = vmatpush1.bf16.msra.mxu0 %v1472_v55  ;;  %804 = vmatprep.mubr.bf16.mxu0 %v1531_v56 }
  0x8e   :  { %1237 = vmatmul.mubr.msk.bf16.vlgmr.msra.gmra.mrb[0].mxu0 %vm645_vm0, %v44_v58 }
 0x12e   :  { %v683_v2 = vpop.f32.mrb[0].mxu1 }
 0x12f   :  { %v685_v3 = vpop.f32.mrb[1].mxu1  ;;  %v684_v13 = vadd.f32 %v683_v2, %v148_v11 }
 0x130   :  { %v687_v4 = vpop.f32.mrb[2].mxu1  ;;  %v686_v14 = vadd.f32 %v685_v3, %v152_v12 }
 0x131   :  { %v688_v5 = vpop.f32.mrb[3].mxu1 }
 0x161   :  { %v806_v15 = vpop.f32.mrb[0].mxu0 }
 0x162   :  { %v1317_v16 = vadd.f32 %v806_v15, %v684_v13  ;;  %v808_v17 = vpop.f32.mrb[1].mxu0 }
 0x163   :  { %v1319_v18 = vadd.f32 %v808_v17, %v686_v14  ;;  %v810_v19 = vpop.f32.mrb[2].mxu0 }
 0x164   :  { %v813_v20 = vmax.f32 %v1317_v16, 0.0  ;;  %v811_v21 = vpop.f32.mrb[3].mxu0 }
 0x165   :  { %v814_v22 = vmax.f32 %v1319_v18, 0.0 }
 0x166   :  { %v815_v25 = vpack.c.bf16 %v813_v20, %v813_v20 }
 0x167   :  { %v816_v23 = vpack.c.bf16 %v814_v22, %v814_v22 }
 0x169   :  { %984 = vmatprep.mubr.bf16.mxu1 %v816_v23 }
 0x16a   :  { %985 = vmatmul.mubr.bf16.vlgmr.msra.gmra.mrb[4].mxu1 %v815_v25 }
 0x16b   :  { %1297 = vmatpush3.bf16.msra.mxu1 %v1495_v24  ;;  %1312 = vmatprep.mubr.msk.bf16.mxu1 %vm1533_vm1, %v1532_v1 }
 0x16c   :  { %1298 = vmatprep.subr.bf16.mxu1 %v1532_v1 }
 0x16f   :  { %1299 = vmatpush3.bf16.msra.mxu1 %v1496_v26 }
 0x170   :  { %1300 = vmatprep.subr.bf16.mxu1 %v1532_v1 }
 0x173   :  { %1301 = vmatpush3.bf16.msra.mxu1 %v1497_v27 }
 0x174   :  { %1302 = vmatprep.subr.bf16.mxu1 %v1532_v1 }
 0x177   :  { %1303 = vmatpush3.bf16.msra.mxu1 %v1498_v28 }
 0x178   :  { %1304 = vmatprep.subr.bf16.mxu1 %v1532_v1 }
 0x17b   :  { %1305 = vmatpush3.bf16.msra.mxu1 %v1499_v29 }
 0x17c   :  { %1306 = vmatprep.subr.bf16.mxu1 %v1532_v1 }
 0x17f   :  { %1307 = vmatpush3.bf16.msra.mxu1 %v1500_v30 }
 0x180   :  { %1308 = vmatprep.subr.bf16.mxu1 %v1532_v1 }
 0x183   :  { %1309 = vmatpush3.bf16.msra.mxu1 %v1501_v31 }
 0x184   :  { %1310 = vmatprep.subr.bf16.mxu1 %v1532_v1 }
 0x187   :  { %1311 = vmatpush3.bf16.msra.mxu1 %v1502_v32 }
 0x23d   :  { %v1281_v33 = vpop.f32.mrb[4].mxu1 }
 0x23e   :  { %v1282_v35 = vpop.f32.mrb[5].mxu1 }
 0x23f   :  { %v1283_v36 = vadd.f32 %v1282_v35, %v1281_v33  ;;  %v1284_v37 = vpop.f32.mrb[6].mxu1 }
 0x240   :  { %v1285_v38 = vpop.f32.mrb[7].mxu1 }
 0x241   :  { %v987_v39 = vadd.f32 %v1283_v36, %v1238_v34 }
 0x243   :  { %v992_v40 = vmax.f32 %v987_v39, 0.0 }
 0x245   :  { %v993_v41 = vpack.c.bf16 %v992_v40, %v992_v40 }
 0x247   :  { %1313 = vmatmul.mubr.bf16.vlgmr.msra.gmra.mrb[8].mxu1 %v993_v41 }
 0x31a   :  { %v1099_v43 = vpop.f32.mrb[8].mxu1 }
 0x31b   :  { %v1100_v44 = vadd.f32 %v1255_v42, %v1099_v43  ;;  %v1314_v45 = vpop.f32.mrb[9].mxu1 }
 0x31c   :  { %v1102_v46 = vpop.f32.mrb[10].mxu1 }
 0x31d   :  { %v1105_v48 = vmax.f32 %v1100_v44, 0.0  ;;  %v1315_v49 = vpop.f32.mrb[11].mxu1 }
 0x31f   :  { %v1113_v50 = vadd.f32 %v1264_v47, %v1105_v48 }
 0x321   :  { %1114 = vmax.xlane.f32.xlu0 %v1113_v50 }
 0x3ae   :  { %v1115_v51 = vpop.xlane.xlu0 %1114 }
 0x3af   :  { %v1116_v52 = vsub.f32 %v1113_v50, %v1115_v51 }
 0x3b1   :  { %v1117_v53 = vmul.f32 1.442695, %v1116_v52 }
 0x3b3   :  { %1503 = vpow2.f32 %v1117_v53 }
 0x3bd   :  { %v1504_v54 = vpop.eup %1503 }
 0x3be   :  { %1119 = vadd.xlane.f32.xlu0 %v1504_v54 }
 0x44b   :  { %v1120_v55 = vpop.xlane.xlu0 %1119 }
 0x44c   :  { %1505 = vlog2.f32 %v1120_v55 }
 0x456   :  { %v1506_v56 = vpop.eup %1505 }
 0x457   :  { %v1122_v57 = vmul.f32 0.6931472, %v1506_v56 }
 0x459   :  { %v1123_v58 = vsub.f32 %v1116_v52, %v1122_v57 }
 0x45b   :  { %1124 = vst [vmem:[#allocation2] sm:$0xff] %v1123_v58 }
 0x45c   :  { %1518 = shalt.err (!%p1515_p4)
}
 0x45d   :  { %s1519_s24 = scalar_lea.hbm %s1999_s8, 128 }
 0x45e   :  { %p1520_p5 = scmp.ne.s32.totalorder %s1999_s8, %s1519_s24  ;;  %p1523_p6 = scmp.lt.u32.totalorder %s1519_s24, %s1999_s8 }
 0x460   :  { %p1525_p7 = pnand %p1523_p6, %p1520_p5 }
 0x462   :  { %1528 = shalt.err (!%p1525_p7)
}
 0x463   :  { %1134 = dma.vmem_to_hbm [thread:$0]  %s1132_s6, 128, %s1999_s8, [#allocation3]  }
 0x464   :  { %1529 = dma.done.wait [#allocation3], 128  }
 0x465   :  { %1530 = vsyncadd [#allocation3], 4294967168 }
 0x466   :  { %1138 = vsyncpa [#allocation3], 1 }

</bundles_post_ra>
